<compile_context>
chip_gen: v5e
topology: v5e:2x2
jax: 0.10.0
libtpu: 0.0.40
codegen_flags: <defaults>
</compile_context>

<pallas_src>
import functools

import jax
import jax.numpy as jnp
from jax import lax
from jax.experimental import pallas as pl
from jax.experimental.pallas import tpu as pltpu

_LANE = 128
_SUB = 8
_MAX_TILE_ROWS = 1024     # 1024 * 128 * 4B = 0.5 MiB per f32 block
_MAX_BATCH_PACK = 16


def _round_up(n, m):
    return ((n + m - 1) // m) * m


def _cdiv(a, b):
    return (a + b - 1) // b


def _divmod_const(x, d):
    """(x // d, x % d) for a non-negative int32 array and python int d > 0.
    Uses shift/and when d is a power of two (cheap and always supported)."""
    if d & (d - 1) == 0:
        s = d.bit_length() - 1
        return jnp.right_shift(x, s), jnp.bitwise_and(x, d - 1)
    return jnp.floor_divide(x, d), jnp.remainder(x, d)


def _spec_aug_kernel(tbgn_ref, twid_ref, fbgn_ref, fwid_ref, x_ref, o_ref, *,
                     bb, T, F, tsn, fsn):
    """Zero time/freq stripes for `bb` packed batch elements.

    Block shape: (bb, tile_rows, 128) over the lane-dense flattened slab layout.
    Scalar-prefetch refs are flat 1-D int32: index = batch * stripes + stripe.
    """
    bi = pl.program_id(0)
    ri = pl.program_id(1)
    tile_rows = x_ref.shape[1]
    lane = x_ref.shape[2]

    # Flat position of every element of this row tile inside one batch slab.
    base = ri * (tile_rows * lane)
    pos = (base
           + lax.broadcasted_iota(jnp.int32, (tile_rows, lane), 0) * lane
           + lax.broadcasted_iota(jnp.int32, (tile_rows, lane), 1))
    q, f_idx = _divmod_const(pos, F)        # f = pos % F
    _, t_idx = _divmod_const(q, T)          # t = (pos // F) % T

    zero = jnp.zeros((), x_ref.dtype)
    for i in range(bb):                     # static unroll over packed batch elems
        b = bi * bb + i
        drop = jnp.zeros((tile_rows, lane), jnp.bool_)
        for s in range(tsn):                # time stripes (dim 2)
            bgn = tbgn_ref[b * tsn + s]
            drop |= (t_idx >= bgn) & (t_idx < bgn + twid_ref[b * tsn + s])
        for s in range(fsn):                # freq stripes (dim 3)
            bgn = fbgn_ref[b * fsn + s]
            drop |= (f_idx >= bgn) & (f_idx < bgn + fwid_ref[b * fsn + s])
        o_ref[i] = jnp.where(drop, zero, x_ref[i])


@functools.partial(jax.jit, static_argnames=("tdw", "tsn", "fdw", "fsn", "p"))
def _spec_aug_impl(x, key, *, tdw, tsn, fdw, fsn, p):
    B, C, T, F = x.shape
    kp, k1, k2, k3, k4 = jax.random.split(key, 5)

    # ---- sample stripe params (same ranges as torch.randint in the reference) ----
    tdw_c = max(min(tdw, T), 1)
    fdw_c = max(min(fdw, F), 1)
    tsn_e, fsn_e = max(tsn, 1), max(fsn, 1)
    t_wid = jax.random.randint(k1, (B, tsn_e), 0, tdw_c, dtype=jnp.int32)
    t_bgn = jax.random.randint(k2, (B, tsn_e), 0, T - t_wid, dtype=jnp.int32)
    f_wid = jax.random.randint(k3, (B, fsn_e), 0, fdw_c, dtype=jnp.int32)
    f_bgn = jax.random.randint(k4, (B, fsn_e), 0, F - f_wid, dtype=jnp.int32)
    if tsn == 0:
        t_wid = jnp.zeros_like(t_wid)
    if fsn == 0:
        f_wid = jnp.zeros_like(f_wid)
    if p < 1.0:
        # Probability gate without host sync: width 0 == identity.
        gate = jax.random.uniform(kp) < p
        t_wid = jnp.where(gate, t_wid, 0)
        f_wid = jnp.where(gate, f_wid, 0)

    # ---- lane-dense flatten / pad / tile selection ----
    flat_len = C * T * F
    n_rows = _round_up(_cdiv(flat_len, _LANE), _SUB)
    k_tiles = _cdiv(n_rows, _MAX_TILE_ROWS)
    tile_rows = _round_up(_cdiv(n_rows, k_tiles), _SUB)
    rows_pad = k_tiles * tile_rows

    bb = max(1, min(B, _MAX_TILE_ROWS // tile_rows, _MAX_BATCH_PACK))
    if B >= 2:
        bb = min(bb, B // 2)   # keep >= 2 batch groups so both v7x TCs get work
    b_pad = _round_up(B, bb)

    x_flat = x.reshape(B, flat_len)
    x_flat = jnp.pad(x_flat, ((0, b_pad - B), (0, rows_pad * _LANE - flat_len)))
    x_slab = x_flat.reshape(b_pad, rows_pad, _LANE)

    def _flat_i32(a):
        if b_pad != B:
            a = jnp.pad(a, ((0, b_pad - B), (0, 0)))   # padded batches: width 0
        return a.reshape(-1)

    kernel = functools.partial(_spec_aug_kernel, bb=bb, T=T, F=F,
                               tsn=tsn_e, fsn=fsn_e)
    block = (bb, tile_rows, _LANE)
    grid = (b_pad // bb, rows_pad // tile_rows)

    out = pl.pallas_call(
        kernel,
        out_shape=jax.ShapeDtypeStruct((b_pad, rows_pad, _LANE), x.dtype),
        grid_spec=pltpu.PrefetchScalarGridSpec(
            num_scalar_prefetch=4,
            grid=grid,
            in_specs=[pl.BlockSpec(block, lambda bi, ri, *_: (bi, ri, 0))],
            out_specs=pl.BlockSpec(block, lambda bi, ri, *_: (bi, ri, 0)),
        ),
        compiler_params=pltpu.CompilerParams(
            dimension_semantics=("parallel", "parallel")),
        # x_slab is flattened input #4 (after the 4 scalar-prefetch args).
        input_output_aliases={4: 0},
    )(_flat_i32(t_bgn), _flat_i32(t_wid), _flat_i32(f_bgn), _flat_i32(f_wid), x_slab)

    out = out.reshape(b_pad, rows_pad * _LANE)[:B, :flat_len]
    return out.reshape(B, C, T, F)


def spec_augmentation(x, key, *, time_drop_width, time_stripes_num,
                      freq_drop_width, freq_stripes_num,
                      time_dim=2, freq_dim=3, training=True, p=1.0):
    """JAX/Pallas equivalent of SpecAugmentation.forward (training applies the stripe
    dropping; eval mode is the identity). `inplace` has no meaning in JAX — the input
    buffer is instead aliased to the output inside the kernel call."""
    if (time_dim, freq_dim) != (2, 3):
        raise ValueError(f"Only time_dim=2 / freq_dim=3 supported, got {(time_dim, freq_dim)}.")
    if time_drop_width <= 0 or freq_drop_width <= 0:
        raise ValueError("drop_width must be > 0.")

    orig_ndim = x.ndim
    if x.ndim == 2:
        x = x[None, None]
    elif x.ndim == 3:
        x = x[None]
    if x.ndim != 4:
        raise ValueError(f"Invalid ndim={orig_ndim}, expected 2, 3 or 4.")

    if not training:
        y = x
    else:
        y = _spec_aug_impl(x, key,
                           tdw=int(time_drop_width), tsn=int(time_stripes_num),
                           fdw=int(freq_drop_width), fsn=int(freq_stripes_num),
                           p=float(p))

    if orig_ndim == 2:
        return y[0, 0]
    if orig_ndim == 3:
        return y[0]
    return y


if __name__ == "__main__":
    key = jax.random.PRNGKey(0)
    kx, kaug = jax.random.split(key)

    # Small shapes: batch=2, channels=4, time_steps=16, freq_bins=16
    x = jax.random.normal(kx, (2, 4, 16, 16), dtype=jnp.float32)

    y = spec_augmentation(x, kaug,
                          time_drop_width=4, time_stripes_num=2,
                          freq_drop_width=4, freq_stripes_num=2,
                          training=True, p=1.0)
    y = jax.block_until_ready(y)
    assert y.shape == x.shape and y.dtype == x.dtype

    # Output is x with dropped positions written to exactly 0 (never scaled/added).
    assert bool(jnp.all((y == x) | (y == 0.0)))
    # Dropped positions are identical across channels (stripes span the whole C axis).
    dropped = (y == 0.0) & (x != 0.0)
    assert bool(jnp.all(dropped == dropped[:, :1]))
    # Eval mode is the identity.
    y_eval = spec_augmentation(x, kaug,
                               time_drop_width=4, time_stripes_num=2,
                               freq_drop_width=4, freq_stripes_num=2,
                               training=False)
    assert bool(jnp.all(y_eval == x))
    # 3-D (channels, time, freq) input path.
    y3 = spec_augmentation(x[0], kaug,
                           time_drop_width=4, time_stripes_num=2,
                           freq_drop_width=4, freq_stripes_num=2,
                           training=True, p=1.0)
    y3 = jax.block_until_ready(y3)
    assert y3.shape == x[0].shape

    print("KERNEL_OK")
</pallas_src>

<mosaic_0001>
module attributes {stable_mosaic.version = 11 : i64} {
  func.func @_spec_aug_kernel(%arg0: i32, %arg1: i32, %arg2: memref<4xi32, #tpu.memory_space<smem>>, %arg3: memref<4xi32, #tpu.memory_space<smem>>, %arg4: memref<4xi32, #tpu.memory_space<smem>>, %arg5: memref<4xi32, #tpu.memory_space<smem>>, %arg6: memref<1x8x128xf32, #tpu.memory_space<vmem>>, %arg7: memref<1x8x128xf32, #tpu.memory_space<vmem>>) attributes {dimension_semantics = [#tpu.dimension_semantics<parallel>, #tpu.dimension_semantics<parallel>], iteration_bounds = array<i64: 2, 1>, scalar_prefetch = 4 : i64, scratch_operands = 0 : i64, tpu.core_type = #tpu.core_type<tc>, window_params = [{transform_indices = @transform_0, window_bounds = array<i64: 1, 8, 128>}, {transform_indices = @transform_1, window_bounds = array<i64: 1, 8, 128>}]} {
    %c1024_i32 = arith.constant 1024 : i32
    %0 = arith.muli %arg1, %c1024_i32 : i32
    %1 = tpu.iota {dimensions = array<i32: 0>} : vector<8x128xi32>
    %c128_i32 = arith.constant 128 : i32
    %2 = vector.broadcast %c128_i32 : i32 to vector<8x128xi32>
    %3 = arith.muli %1, %2 : vector<8x128xi32>
    %4 = vector.broadcast %0 : i32 to vector<8x128xi32>
    %5 = arith.addi %4, %3 : vector<8x128xi32>
    %6 = tpu.iota {dimensions = array<i32: 1>} : vector<8x128xi32>
    %7 = arith.addi %5, %6 : vector<8x128xi32>
    %c4_i32 = arith.constant 4 : i32
    %8 = vector.broadcast %c4_i32 : i32 to vector<8x128xi32>
    %9 = arith.shrsi %7, %8 : vector<8x128xi32>
    %c15_i32 = arith.constant 15 : i32
    %10 = vector.broadcast %c15_i32 : i32 to vector<8x128xi32>
    %11 = arith.andi %7, %10 : vector<8x128xi32>
    %c15_i32_0 = arith.constant 15 : i32
    %12 = vector.broadcast %c15_i32_0 : i32 to vector<8x128xi32>
    %13 = arith.andi %9, %12 : vector<8x128xi32>
    %c1_i32 = arith.constant 1 : i32
    %14 = arith.muli %arg0, %c1_i32 : i32
    %c0_i32 = arith.constant 0 : i32
    %15 = arith.addi %14, %c0_i32 : i32
    %false = arith.constant false
    %16 = vector.broadcast %false : i1 to vector<8x128xi1>
    %c2_i32 = arith.constant 2 : i32
    %17 = arith.muli %15, %c2_i32 : i32
    %c0_i32_1 = arith.constant 0 : i32
    %18 = arith.addi %17, %c0_i32_1 : i32
    %19 = arith.index_cast %18 : i32 to index
    %20 = memref.load %arg2[%19] : memref<4xi32, #tpu.memory_space<smem>>
    %21 = vector.broadcast %20 : i32 to vector<8x128xi32>
    %22 = arith.cmpi sge, %13, %21 : vector<8x128xi32>
    %c2_i32_2 = arith.constant 2 : i32
    %23 = arith.muli %15, %c2_i32_2 : i32
    %c0_i32_3 = arith.constant 0 : i32
    %24 = arith.addi %23, %c0_i32_3 : i32
    %25 = arith.index_cast %24 : i32 to index
    %26 = memref.load %arg3[%25] : memref<4xi32, #tpu.memory_space<smem>>
    %27 = arith.addi %20, %26 : i32
    %28 = vector.broadcast %27 : i32 to vector<8x128xi32>
    %29 = arith.cmpi slt, %13, %28 : vector<8x128xi32>
    %30 = arith.andi %22, %29 : vector<8x128xi1>
    %31 = arith.ori %16, %30 : vector<8x128xi1>
    %c2_i32_4 = arith.constant 2 : i32
    %32 = arith.muli %15, %c2_i32_4 : i32
    %c1_i32_5 = arith.constant 1 : i32
    %33 = arith.addi %32, %c1_i32_5 : i32
    %34 = arith.index_cast %33 : i32 to index
    %35 = memref.load %arg2[%34] : memref<4xi32, #tpu.memory_space<smem>>
    %36 = vector.broadcast %35 : i32 to vector<8x128xi32>
    %37 = arith.cmpi sge, %13, %36 : vector<8x128xi32>
    %c2_i32_6 = arith.constant 2 : i32
    %38 = arith.muli %15, %c2_i32_6 : i32
    %c1_i32_7 = arith.constant 1 : i32
    %39 = arith.addi %38, %c1_i32_7 : i32
    %40 = arith.index_cast %39 : i32 to index
    %41 = memref.load %arg3[%40] : memref<4xi32, #tpu.memory_space<smem>>
    %42 = arith.addi %35, %41 : i32
    %43 = vector.broadcast %42 : i32 to vector<8x128xi32>
    %44 = arith.cmpi slt, %13, %43 : vector<8x128xi32>
    %45 = arith.andi %37, %44 : vector<8x128xi1>
    %46 = arith.ori %31, %45 : vector<8x128xi1>
    %c2_i32_8 = arith.constant 2 : i32
    %47 = arith.muli %15, %c2_i32_8 : i32
    %c0_i32_9 = arith.constant 0 : i32
    %48 = arith.addi %47, %c0_i32_9 : i32
    %49 = arith.index_cast %48 : i32 to index
    %50 = memref.load %arg4[%49] : memref<4xi32, #tpu.memory_space<smem>>
    %51 = vector.broadcast %50 : i32 to vector<8x128xi32>
    %52 = arith.cmpi sge, %11, %51 : vector<8x128xi32>
    %c2_i32_10 = arith.constant 2 : i32
    %53 = arith.muli %15, %c2_i32_10 : i32
    %c0_i32_11 = arith.constant 0 : i32
    %54 = arith.addi %53, %c0_i32_11 : i32
    %55 = arith.index_cast %54 : i32 to index
    %56 = memref.load %arg5[%55] : memref<4xi32, #tpu.memory_space<smem>>
    %57 = arith.addi %50, %56 : i32
    %58 = vector.broadcast %57 : i32 to vector<8x128xi32>
    %59 = arith.cmpi slt, %11, %58 : vector<8x128xi32>
    %60 = arith.andi %52, %59 : vector<8x128xi1>
    %61 = arith.ori %46, %60 : vector<8x128xi1>
    %c2_i32_12 = arith.constant 2 : i32
    %62 = arith.muli %15, %c2_i32_12 : i32
    %c1_i32_13 = arith.constant 1 : i32
    %63 = arith.addi %62, %c1_i32_13 : i32
    %64 = arith.index_cast %63 : i32 to index
    %65 = memref.load %arg4[%64] : memref<4xi32, #tpu.memory_space<smem>>
    %66 = vector.broadcast %65 : i32 to vector<8x128xi32>
    %67 = arith.cmpi sge, %11, %66 : vector<8x128xi32>
    %c2_i32_14 = arith.constant 2 : i32
    %68 = arith.muli %15, %c2_i32_14 : i32
    %c1_i32_15 = arith.constant 1 : i32
    %69 = arith.addi %68, %c1_i32_15 : i32
    %70 = arith.index_cast %69 : i32 to index
    %71 = memref.load %arg5[%70] : memref<4xi32, #tpu.memory_space<smem>>
    %72 = arith.addi %65, %71 : i32
    %73 = vector.broadcast %72 : i32 to vector<8x128xi32>
    %74 = arith.cmpi slt, %11, %73 : vector<8x128xi32>
    %75 = arith.andi %67, %74 : vector<8x128xi1>
    %76 = arith.ori %61, %75 : vector<8x128xi1>
    %c0 = arith.constant 0 : index
    %c0_16 = arith.constant 0 : index
    %c0_17 = arith.constant 0 : index
    %77 = vector.load %arg6[%c0, %c0_16, %c0_17] : memref<1x8x128xf32, #tpu.memory_space<vmem>>, vector<1x8x128xf32>
    %78 = vector.shape_cast %77 : vector<1x8x128xf32> to vector<8x128xf32>
    %cst = arith.constant 0.000000e+00 : f32
    %79 = vector.broadcast %cst : f32 to vector<8x128xf32>
    %80 = arith.select %76, %79, %78 : vector<8x128xi1>, vector<8x128xf32>
    %c0_18 = arith.constant 0 : index
    %c0_19 = arith.constant 0 : index
    %c0_20 = arith.constant 0 : index
    %81 = vector.load %arg7[%c0_18, %c0_19, %c0_20] : memref<1x8x128xf32, #tpu.memory_space<vmem>>, vector<1x8x128xf32>
    %82 = vector.shape_cast %81 : vector<1x8x128xf32> to vector<8x128xf32>
    %83 = vector.shape_cast %80 : vector<8x128xf32> to vector<1x8x128xf32>
    tpu.vector_store %arg7[%c0_18, %c0_19, %c0_20], %83 {strides = array<i32>} : memref<1x8x128xf32, #tpu.memory_space<vmem>>, vector<1x8x128xf32>,
    return
  }
  func.func @transform_0(%arg0: i32, %arg1: i32, %arg2: memref<4xi32, #tpu.memory_space<smem>>, %arg3: memref<4xi32, #tpu.memory_space<smem>>, %arg4: memref<4xi32, #tpu.memory_space<smem>>, %arg5: memref<4xi32, #tpu.memory_space<smem>>) -> (i32, i32, i32) {
    %c0_i32 = arith.constant 0 : i32
    %c0_i32_0 = arith.constant 0 : i32
    return %arg0, %arg1, %c0_i32 : i32, i32, i32
  }
  func.func @transform_1(%arg0: i32, %arg1: i32, %arg2: memref<4xi32, #tpu.memory_space<smem>>, %arg3: memref<4xi32, #tpu.memory_space<smem>>, %arg4: memref<4xi32, #tpu.memory_space<smem>>, %arg5: memref<4xi32, #tpu.memory_space<smem>>) -> (i32, i32, i32) {
    %c0_i32 = arith.constant 0 : i32
    %c0_i32_0 = arith.constant 0 : i32
    return %arg0, %arg1, %c0_i32 : i32, i32, i32
  }
}

</mosaic_0001>

<bundles_post_ra>
// kernel: _spec_aug_impl.3
= control target key start
LH: loop header
LB: loop body
LE: loop exit
PB: predicated region body
PF: predicated region fallthrough
CT: control target
= control target key end

     0   :  { %s408_s24 = smov [#allocation3]   ;;  %s409_s25 = smov [#allocation4]   ;;  %s496_s0 = inlined_call_operand.vmem [shape: s32[4], index: 0, kind: input, shape index: {}]   ;;  %s497_s4 = inlined_call_operand.vmem [shape: f32[2,8,128], index: 4, kind: input, shape index: {}, may-alias: {4,5}]   ;;  %s498_s5 = inlined_call_operand.vmem [shape: f32[2,8,128], index: 5, kind: output, shape index: {}, may-alias: {4,5}]   ;;  %s499_s1 = inlined_call_operand.vmem [shape: s32[4], index: 1, kind: input, shape index: {}]   ;;  %s500_s2 = inlined_call_operand.vmem [shape: s32[4], index: 2, kind: input, shape index: {}]   ;;  %s501_s3 = inlined_call_operand.vmem [shape: s32[4], index: 3, kind: input, shape index: {}]  }
   0x1   :  { %s11_s20 = sshll.u32 %s496_s0, 4  ;;  %s16_s23 = sshll.u32 %s499_s1, 4  ;;  %s12_s20 = int_to_ptr.vmem [resolvable:$true] %s11_s20  ;;  %s17_s23 = int_to_ptr.vmem [resolvable:$true] %s16_s23 }
   0x2   :  { %14 = dma.vmem_to_smem %s12_s20, 16, %s408_s24, [#allocation2] }
   0x3   :  { %19 = dma.vmem_to_smem %s17_s23, 16, %s409_s25, [#allocation2] }
   0x4   :  { %s21_s28 = sshll.u32 %s500_s2, 4  ;;  %s26_s6 = sshll.u32 %s501_s3, 4  ;;  %s22_s28 = int_to_ptr.vmem [resolvable:$true] %s21_s28  ;;  %s27_s6 = int_to_ptr.vmem [resolvable:$true] %s26_s6 }
   0x5   :  { %s410_s0 = smov [#allocation5]   ;;  %s411_s7 = smov [#allocation6]  }
   0x6   :  { %24 = dma.vmem_to_smem %s22_s28, 16, %s410_s0, [#allocation2] }
   0x7   :  { %29 = dma.vmem_to_smem %s27_s6, 16, %s411_s7, [#allocation2] }
   0x8   :  { %394 = dma.done.wait [#allocation2], 64 }
   0x9   :  { %395 = vsyncadd [#allocation2], 4294967232 }
   0xa   :  { %32 = sfence }
   0xb   :  { %s454_s1 = smov 0   ;;  %s456_s8 = smov 0  }
   0xc   :  { %s458_s9 = smov 0  }
   0xd LB: > { %s50_s2 = sadd.s32 1, %s402_s8  ;;  %p300_p0 = scmp.ge.s32.totalorder %s406_s9, 1  ;;  %s406_s9 = sphi %s458_s9, %s38_s9   ;;  %s402_s8 = sphi %s456_s8, %s505_s8   ;;  %s398_s1 = sphi %s454_s1, %s504_s1  }
   0xe   : > { %p52_p1 = scmp.ge.s32.totalorder %s50_s2, 2  ;;  %p132_p2 = scmp.lt.s32.totalorder %s406_s9, 3 }
  0x10   : > { %s507_s2 = smov (%p52_p1, %s50_s2), 0  ;;  %p133_p3 = pnand %p300_p0, %p132_p2 }
  0x11   : > { %p156_p4 = scmp.lt.s32.totalorder (!%p133_p3), %s398_s1, 1  ;;  %s303_s3 = sshll.u32 (!%p133_p3), %s398_s1, 1 }
  0x12   : > { %136 = sbr.rel (%p133_p3) target bundleno = 43 (0x2b), region = 24  ;;  %s183_s10 = sld [smem:[#allocation3 + %s303_s3]] (!%p133_p3) }
  0x13   : > { %s191_s11 = sadd.s32 (!%p133_p3), 1, %s303_s3  ;;  %s186_s12 = sld [smem:[#allocation4 + %s303_s3]] (!%p133_p3) }
  0x14   : > { %s192_s13 = sld [smem:[#allocation3 + %s191_s11]] (!%p133_p3) }
  0x15   : > { %s195_s14 = sld [smem:[#allocation4 + %s191_s11]] (!%p133_p3) }
  0x16   : > { %s201_s15 = sld [smem:[#allocation5 + %s303_s3]] (!%p133_p3) }
  0x17   : > { %v171_v0 = vlaneseq  ;;  %s509_s1 = smov (!%p156_p4, %s398_s1), 1  ;;  %s204_s16 = sld [smem:[#allocation6 + %s303_s3]] }
  0x18   : > { %v184_v6 = vstv %s183_s10  ;;  %s210_s18 = sld [smem:[#allocation5 + %s191_s11]]  ;;  %s301_s20 = sshll.u32 %s509_s1, 3 }
  0x19   : > { %v172_v1 = vshrl.u32 %v171_v0, 7  ;;  %v177_v2 = vand.u32 127, %v171_v0  ;;  %s187_s17 = sadd.s32 %s186_s12, %s183_s10  ;;  %s213_s19 = sld [smem:[#allocation6 + %s191_s11]] }
  0x1a   : > { %v188_v9 = vstv %s187_s17  ;;  %v193_v10 = vstv %s192_s13  ;;  %s162_s25 = scalar_lea.vmem %s497_s4, %s301_s20  ;;  %s169_s29 = scalar_lea.vmem %s498_s5, %s301_s20 }
  0x1b   : > { %v173_v3 = vmul.u32 128, %v172_v1  ;;  %s196_s21 = sadd.s32 %s195_s14, %s192_s13  ;;  %v219_v17 = vld [vmem:[%s162_s25] sm:$0xff] }
  0x1c   : > { %v197_v12 = vstv %s196_s21  ;;  %v202_v13 = vstv %s201_s15 }
  0x1d   : > { %v178_v4 = vadd.s32 %v177_v2, %v173_v3  ;;  %s205_s22 = sadd.s32 %s204_s16, %s201_s15 }
  0x1e   : > { %v206_v14 = vstv %s205_s22  ;;  %v211_v15 = vstv %s210_s18 }
  0x1f   : > { %v179_v5 = vshra.s32 %v178_v4, 4  ;;  %v180_v7 = vand.u32 15, %v178_v4  ;;  %s214_s26 = sadd.s32 %s213_s19, %s210_s18 }
  0x20   : > { %v215_v16 = vstv %s214_s26 }
  0x21   : > { %v181_v8 = vand.u32 15, %v179_v5  ;;  %vm203_vm5 = vcmp.ge.s32.totalorder %v180_v7, %v202_v13  ;;  %vm207_vm8 = vcmp.lt.s32.totalorder %v180_v7, %v206_v14  ;;  %vm212_vm9 = vcmp.ge.s32.totalorder %v180_v7, %v211_v15 }
  0x22   : > { %vm208_vm10 = vmand %vm203_vm5, %vm207_vm8  ;;  %vm216_vm12 = vcmp.lt.s32.totalorder %v180_v7, %v215_v16 }
  0x23   : > { %vm185_vm0 = vcmp.ge.s32.totalorder %v181_v8, %v184_v6  ;;  %vm189_vm1 = vcmp.lt.s32.totalorder %v181_v8, %v188_v9  ;;  %vm194_vm2 = vcmp.ge.s32.totalorder %v181_v8, %v193_v10  ;;  %vm198_vm4 = vcmp.lt.s32.totalorder %v181_v8, %v197_v12  ;;  %vm217_vm13 = vmand %vm212_vm9, %vm216_vm12 }
  0x24   : > { %vm475_vm3 = vmand %vm185_vm0, %vm189_vm1 }
  0x25   : > { %vm199_vm6 = vmand %vm194_vm2, %vm198_vm4 }
  0x26   : > { %vm200_vm7 = vmor %vm475_vm3, %vm199_vm6 }
  0x27   : > { %vm209_vm11 = vmor %vm200_vm7, %vm208_vm10 }
  0x28   : > { %vm218_vm14 = vmor %vm209_vm11, %vm217_vm13 }
  0x29   : > { %v220_v18 = vsel %vm218_vm14, 0.0, %v219_v17 }
  0x2a   : > { %221 = vst [vmem:[%s169_s29] sm:$0xff] %v220_v18 }
  0x2b PF: > { %s38_s9 = sadd.s32 1, %s406_s9   ;;  %s504_s1 = smov %s402_s8 }
  0x2c   : > { %p35_p5 = scmp.ge.s32.totalorder %s38_s9, 4   ;;  %s505_s8 = smov %s507_s2 }
  0x2e   :  { %37 = sbr.rel (!%p35_p5) target bundleno = 13 (0xd), region = 54 }

</bundles_post_ra>
